<compile_context>
chip_gen: v5e
topology: v5e:2x2
jax: 0.10.0
libtpu: 0.0.40
codegen_flags: <defaults>
</compile_context>

<pallas_src>
import jax
import jax.numpy as jnp
from jax.experimental import pallas as pl
from jax.experimental.pallas import tpu as pltpu


# ----------------------------------------------------------------------------
# Pallas kernel: fused HBM->HBM DMA identity copy, one descriptor per tensor.
# ----------------------------------------------------------------------------
def _make_dma_copy_kernel(n_tensors: int):
    """Kernel copying n_tensors HBM refs to n_tensors HBM outputs via DMA."""

    def kernel(*refs):
        in_refs = refs[:n_tensors]
        out_refs = refs[n_tensors:2 * n_tensors]
        sem = refs[2 * n_tensors]          # DMA semaphore array, shape (n,)
        copies = [
            pltpu.make_async_copy(in_refs[i], out_refs[i], sem.at[i])
            for i in range(n_tensors)
        ]
        # Start every transfer first so all DMA engines run concurrently,
        # then wait — pure HBM bandwidth, no VMEM staging, no grid steps.
        for cp in copies:
            cp.start()
        for cp in copies:
            cp.wait()

    return kernel


def _pallas_identity_batch(arrays):
    """Bit-exact copy of a list of arrays with ONE fused Pallas call."""
    n = len(arrays)
    if n == 0:
        return []

    outs = pl.pallas_call(
        _make_dma_copy_kernel(n),
        out_shape=tuple(
            jax.ShapeDtypeStruct(a.shape, a.dtype) for a in arrays
        ),
        in_specs=[pl.BlockSpec(memory_space=pl.ANY) for _ in range(n)],
        out_specs=tuple(pl.BlockSpec(memory_space=pl.ANY) for _ in range(n)),
        scratch_shapes=[pltpu.SemaphoreType.DMA((n,))],
    )(*arrays)
    return list(outs)


# ----------------------------------------------------------------------------
# Policy wrapper mirroring the PyTorch base class.
# ----------------------------------------------------------------------------
class PreTrainedPolicy:
    """JAX/Pallas mirror of the LeRobot PreTrainedPolicy base class."""

    def __init__(self):
        # The reference __init__ registers no parameters.
        pass

    def select_action(self, batch):
        raise NotImplementedError

    def forward(self, batch):
        # Base class defines no computation; the observable contract is that
        # the batch tensors retain shapes/dtypes/values.  All tensors are
        # routed through a single fused Pallas HBM->HBM DMA identity kernel,
        # each with its own ref/output (no concatenate, no pad, no slicing).
        keys = list(batch.keys())

        kernel_keys, kernel_arrays, passthrough = [], [], {}
        for k in keys:
            v = jnp.asarray(batch[k])
            if v.size == 0:
                passthrough[k] = v              # nothing to move
            elif v.ndim == 0:
                # DMA wants at least rank-1; reshape is a free metadata op.
                kernel_keys.append((k, v.shape))
                kernel_arrays.append(v.reshape(1))
            else:
                kernel_keys.append((k, None))
                kernel_arrays.append(v)

        copied = _pallas_identity_batch(kernel_arrays)

        out = dict(passthrough)
        for (k, orig_shape), c in zip(kernel_keys, copied):
            out[k] = c.reshape(orig_shape) if orig_shape is not None else c
        return out

    def __call__(self, batch):
        return self.forward(batch)

    def reset(self):
        pass


if __name__ == "__main__":
    key = jax.random.PRNGKey(0)
    k1, k2, k3 = jax.random.split(key, 3)

    # Small synthetic batch consistent with a robot-policy input dict.
    batch = {
        # layout: NCHW, matching the PyTorch conv-input convention.
        "observation.image": jax.random.normal(k1, (2, 4, 16, 16), jnp.float32),
        "observation.state": jax.random.normal(k2, (2, 32), jnp.float32),
        "action": jax.random.normal(k3, (2, 8, 32), jnp.float32),
    }

    policy = PreTrainedPolicy()
    policy.reset()
    out = policy(batch)
    out = jax.tree_util.tree_map(jax.block_until_ready, out)

    # Verify identity semantics (shape, dtype, values).
    for k in batch:
        assert out[k].shape == batch[k].shape
        assert out[k].dtype == batch[k].dtype
        assert bool(jnp.array_equal(out[k], batch[k]))

    print("KERNEL_OK")
</pallas_src>

<mosaic_0001>
module attributes {stable_mosaic.version = 11 : i64} {
  func.func @kernel(%arg0: memref<2x4x16x16xf32, #tpu.memory_space<any>>, %arg1: memref<2x32xf32, #tpu.memory_space<any>>, %arg2: memref<2x8x32xf32, #tpu.memory_space<any>>, %arg3: memref<2x4x16x16xf32, #tpu.memory_space<any>>, %arg4: memref<2x32xf32, #tpu.memory_space<any>>, %arg5: memref<2x8x32xf32, #tpu.memory_space<any>>, %arg6: memref<3x!tpu.dma_semaphore, #tpu.memory_space<semaphore_mem>>) attributes {dimension_semantics = [], scalar_prefetch = 0 : i64, scratch_operands = 1 : i64, tpu.core_type = #tpu.core_type<tc>} {
    %c0_i32 = arith.constant 0 : i32
    %0 = tpu.memref_slice %arg6[%c0_i32] : memref<3x!tpu.dma_semaphore, #tpu.memory_space<semaphore_mem>> -> memref<1x!tpu.dma_semaphore, #tpu.memory_space<semaphore_mem>>
    %1 = tpu.memref_squeeze %0 : memref<1x!tpu.dma_semaphore, #tpu.memory_space<semaphore_mem>> -> memref<!tpu.dma_semaphore, #tpu.memory_space<semaphore_mem>>
    tpu.enqueue_dma source(%arg0 : memref<2x4x16x16xf32, #tpu.memory_space<any>>) target(%arg3 : memref<2x4x16x16xf32, #tpu.memory_space<any>>) target_semaphore(%1 : memref<!tpu.dma_semaphore, #tpu.memory_space<semaphore_mem>>)
    %c1_i32 = arith.constant 1 : i32
    %2 = tpu.memref_slice %arg6[%c1_i32] : memref<3x!tpu.dma_semaphore, #tpu.memory_space<semaphore_mem>> -> memref<1x!tpu.dma_semaphore, #tpu.memory_space<semaphore_mem>>
    %3 = tpu.memref_squeeze %2 : memref<1x!tpu.dma_semaphore, #tpu.memory_space<semaphore_mem>> -> memref<!tpu.dma_semaphore, #tpu.memory_space<semaphore_mem>>
    tpu.enqueue_dma source(%arg1 : memref<2x32xf32, #tpu.memory_space<any>>) target(%arg4 : memref<2x32xf32, #tpu.memory_space<any>>) target_semaphore(%3 : memref<!tpu.dma_semaphore, #tpu.memory_space<semaphore_mem>>)
    %c2_i32 = arith.constant 2 : i32
    %4 = tpu.memref_slice %arg6[%c2_i32] : memref<3x!tpu.dma_semaphore, #tpu.memory_space<semaphore_mem>> -> memref<1x!tpu.dma_semaphore, #tpu.memory_space<semaphore_mem>>
    %5 = tpu.memref_squeeze %4 : memref<1x!tpu.dma_semaphore, #tpu.memory_space<semaphore_mem>> -> memref<!tpu.dma_semaphore, #tpu.memory_space<semaphore_mem>>
    tpu.enqueue_dma source(%arg2 : memref<2x8x32xf32, #tpu.memory_space<any>>) target(%arg5 : memref<2x8x32xf32, #tpu.memory_space<any>>) target_semaphore(%5 : memref<!tpu.dma_semaphore, #tpu.memory_space<semaphore_mem>>)
    %c0_i32_0 = arith.constant 0 : i32
    %6 = tpu.memref_slice %arg6[%c0_i32_0] : memref<3x!tpu.dma_semaphore, #tpu.memory_space<semaphore_mem>> -> memref<1x!tpu.dma_semaphore, #tpu.memory_space<semaphore_mem>>
    %7 = tpu.memref_squeeze %6 : memref<1x!tpu.dma_semaphore, #tpu.memory_space<semaphore_mem>> -> memref<!tpu.dma_semaphore, #tpu.memory_space<semaphore_mem>>
    tpu.wait_dma2 semaphore(%7 : memref<!tpu.dma_semaphore, #tpu.memory_space<semaphore_mem>>) src(%arg0 : memref<2x4x16x16xf32, #tpu.memory_space<any>>) dst(%arg3 : memref<2x4x16x16xf32, #tpu.memory_space<any>>)
    %c1_i32_1 = arith.constant 1 : i32
    %8 = tpu.memref_slice %arg6[%c1_i32_1] : memref<3x!tpu.dma_semaphore, #tpu.memory_space<semaphore_mem>> -> memref<1x!tpu.dma_semaphore, #tpu.memory_space<semaphore_mem>>
    %9 = tpu.memref_squeeze %8 : memref<1x!tpu.dma_semaphore, #tpu.memory_space<semaphore_mem>> -> memref<!tpu.dma_semaphore, #tpu.memory_space<semaphore_mem>>
    tpu.wait_dma2 semaphore(%9 : memref<!tpu.dma_semaphore, #tpu.memory_space<semaphore_mem>>) src(%arg1 : memref<2x32xf32, #tpu.memory_space<any>>) dst(%arg4 : memref<2x32xf32, #tpu.memory_space<any>>)
    %c2_i32_2 = arith.constant 2 : i32
    %10 = tpu.memref_slice %arg6[%c2_i32_2] : memref<3x!tpu.dma_semaphore, #tpu.memory_space<semaphore_mem>> -> memref<1x!tpu.dma_semaphore, #tpu.memory_space<semaphore_mem>>
    %11 = tpu.memref_squeeze %10 : memref<1x!tpu.dma_semaphore, #tpu.memory_space<semaphore_mem>> -> memref<!tpu.dma_semaphore, #tpu.memory_space<semaphore_mem>>
    tpu.wait_dma2 semaphore(%11 : memref<!tpu.dma_semaphore, #tpu.memory_space<semaphore_mem>>) src(%arg2 : memref<2x8x32xf32, #tpu.memory_space<any>>) dst(%arg5 : memref<2x8x32xf32, #tpu.memory_space<any>>)
    return
  }
}

</mosaic_0001>

<bundles_post_ra>
// kernel: tpu_custom_call.1
= control target key start
LH: loop header
LB: loop body
LE: loop exit
PB: predicated region body
PF: predicated region fallthrough
CT: control target
= control target key end

     0   :  { %s94_s27 = smov [#allocation2]   ;;  %s95_s28 = smov [#allocation3]   ;;  %s149_s0 = inlined_call_operand.hbm [shape: f32[2,4,16,16], index: 0, kind: input, shape index: {}]   ;;  %s150_s3 = inlined_call_operand.hbm [shape: f32[2,4,16,16], index: 3, kind: output, shape index: {0}]   ;;  %s151_s1 = inlined_call_operand.hbm [shape: f32[2,32], index: 1, kind: input, shape index: {}]   ;;  %s152_s4 = inlined_call_operand.hbm [shape: f32[2,32], index: 4, kind: output, shape index: {1}]   ;;  %s153_s2 = inlined_call_operand.hbm [shape: f32[2,8,32], index: 2, kind: input, shape index: {}]   ;;  %s154_s5 = inlined_call_operand.hbm [shape: f32[2,8,32], index: 5, kind: output, shape index: {2}]  }
   0x1   :  { %s15_s20 = sshll.u32 %s149_s0, 4  ;;  %s17_s23 = sshll.u32 %s150_s3, 4  ;;  %s16_s20 = int_to_ptr.hbm [resolvable:$true] %s15_s20  ;;  %s18_s23 = int_to_ptr.hbm [resolvable:$true] %s17_s23 }
   0x2   :  { %s27_s26 = sshll.u32 %s151_s1, 4  ;;  %s96_s29 = smov 0   ;;  %s28_s26 = int_to_ptr.hbm [resolvable:$true] %s27_s26 }
   0x3   :  { %21 = dma.general %s16_s20, 2048, %s18_s23, %s94_s27, %s95_s28, [#allocation4], %s96_s29, 0  }
   0x4   :  { %s29_s7 = sshll.u32 %s152_s4, 4  ;;  %s39_s3 = sshll.u32 %s153_s2, 4  ;;  %s30_s7 = int_to_ptr.hbm [resolvable:$true] %s29_s7  ;;  %s40_s3 = int_to_ptr.hbm [resolvable:$true] %s39_s3 }
   0x5   :  { %s97_s9 = smov [#allocation2 + $0x1]   ;;  %s98_s10 = smov [#allocation5]  }
   0x6   :  { %33 = dma.general %s28_s26, 32, %s30_s7, %s97_s9, %s98_s10, [#allocation6], %s96_s29, 0  }
   0x7   :  { %s41_s12 = sshll.u32 %s154_s5, 4  ;;  %s99_s13 = smov [#allocation2 + $0x2]   ;;  %s42_s12 = int_to_ptr.hbm [resolvable:$true] %s41_s12 }
   0x8   :  { %s100_s14 = smov [#allocation7]  }
   0x9   :  { %45 = dma.general %s40_s3, 256, %s42_s12, %s99_s13, %s100_s14, [#allocation8], %s96_s29, 0  }
   0xa   :  { %88 = dma.done.wait [#allocation2], 2048 }
   0xb   :  { %89 = vsyncadd [#allocation2], 4294965248 }
   0xc   :  { %90 = dma.done.wait [#allocation2 + $0x1], 32 }
   0xd   :  { %91 = vsyncadd [#allocation2 + $0x1], 4294967264 }
   0xe   :  { %92 = dma.done.wait [#allocation2 + $0x2], 256 }
   0xf   :  { %93 = vsyncadd [#allocation2 + $0x2], 4294967040 }
  0x10   :  { %58 = vsyncmov [#allocation2] }
  0x13   :  { %s59_s2 = vpop.sfrf %58 }
  0x14   :  { %p78_p0 = scmp.ne.s32.totalorder %s59_s2, 0 }
  0x16   :  { %63 = shalt.err (%p78_p0)  }
  0x17   :  { %65 = vsyncmov [#allocation2 + $0x1] }
  0x1a   :  { %s66_s4 = vpop.sfrf %65 }
  0x1b   :  { %p79_p1 = scmp.ne.s32.totalorder %s66_s4, 0 }
  0x1d   :  { %70 = shalt.err (%p79_p1)  }
  0x1e   :  { %72 = vsyncmov [#allocation2 + $0x2] }
  0x21   :  { %s73_s5 = vpop.sfrf %72 }
  0x22   :  { %p80_p2 = scmp.ne.s32.totalorder %s73_s5, 0 }
  0x24   :  { %77 = shalt.err (%p80_p2)  }

</bundles_post_ra>
